<compile_context>
chip_gen: v7x
topology: tpu7x:2x2x1
jax: 0.10.0
libtpu: 0.0.40
codegen_flags: <defaults>
</compile_context>

<pallas_src>
import inspect

import jax
import jax.numpy as jnp
from jax.experimental import pallas as pl
from jax.experimental.pallas import tpu as pltpu


def _round_up(x, m):
    return ((x + m - 1) // m) * m


def _supports_pipeline_mode():
    if not hasattr(pl, "Buffered"):
        return False
    try:
        return "pipeline_mode" in inspect.signature(pl.BlockSpec).parameters
    except (TypeError, ValueError):
        # Cannot introspect the signature; pl.Buffered exists so assume OK.
        return True


def _vmem_capacity_bytes():
    try:
        return int(pltpu.get_tpu_info().vmem_capacity_bytes)
    except Exception:
        return 64 << 20  # conservative (v7x-sized) fallback


# ---------------------------------------------------------------------------
# Kernels
# ---------------------------------------------------------------------------

def ffn_kernel_resident(x_ref, w1_ref, b1_ref, w2_ref, b2_ref, o_ref):
    """Whole d_ffn reduction resident in VMEM (weights DMA'd once)."""
    # expand: h = relu(x @ W1 + b1); bias+relu+downcast fused so only one copy
    # of h is materialized before the second MXU matmul.
    h = jnp.dot(x_ref[...], w1_ref[...], preferred_element_type=jnp.float32)
    h = jnp.maximum(h + b1_ref[...].astype(jnp.float32), 0.0).astype(w2_ref.dtype)
    # (dropout = identity in eval mode)
    # contract: out = h @ W2 + b2 (f32 accumulate, cast back on store)
    acc = jnp.dot(h, w2_ref[...], preferred_element_type=jnp.float32)
    o_ref[...] = (acc + b2_ref[...].astype(jnp.float32)).astype(o_ref.dtype)


def ffn_kernel_streaming(x_ref, w1_ref, b1_ref, w2_ref, b2_ref, o_ref, acc_ref):
    """d_ffn split across grid axis 1; f32 accumulator over the reduction."""
    k = pl.program_id(1)

    h = jnp.dot(x_ref[...], w1_ref[...], preferred_element_type=jnp.float32)
    h = jnp.maximum(h + b1_ref[...].astype(jnp.float32), 0.0).astype(w2_ref.dtype)
    partial = jnp.dot(h, w2_ref[...], preferred_element_type=jnp.float32)

    @pl.when(k == 0)
    def _():
        acc_ref[...] = partial          # direct assign: no zero-fill pass

    @pl.when(k > 0)
    def _():
        acc_ref[...] += partial

    @pl.when(k == pl.num_programs(1) - 1)
    def _():
        o_ref[...] = (acc_ref[...]
                      + b2_ref[...].astype(jnp.float32)).astype(o_ref.dtype)


# ---------------------------------------------------------------------------
# Tiling heuristics (VMEM- and d_model-aware)
# ---------------------------------------------------------------------------

def _choose_tiles(Mp, d_model, d_ffn, x_dtype, w_dtype, tm_req):
    xb = jnp.dtype(x_dtype).itemsize
    wb = jnp.dtype(w_dtype).itemsize
    vmem_cap = _vmem_capacity_bytes()
    budget = int(vmem_cap * 0.80)

    def resident_bytes(tm):
        return (2 * tm * d_model * xb                 # x tile (double-buffered)
                + 2 * tm * d_model * xb               # out tile
                + (d_model * d_ffn + d_ffn) * wb      # W1 + b1 (single-buffered)
                + (d_ffn * d_model + d_model) * wb    # W2 + b2
                + tm * d_ffn * (4 + wb))              # f32 h + downcast copy

    def streaming_bytes(tm, tf):
        return (2 * tm * d_model * xb
                + 2 * tm * d_model * xb
                + tm * d_model * 4                    # f32 accumulator scratch
                + 2 * (d_model * tf + tf) * wb        # W1/b1 slices (dbl-buffered)
                + 2 * tf * d_model * wb               # W2 slice
                + 2 * d_model * wb                    # b2
                + tm * tf * (4 + wb))                 # f32 h + downcast copy

    tm = max(min(tm_req, Mp), 8)

    # Prefer keeping the whole reduction (W1/W2) resident: constant-index,
    # single-buffered weight blocks are DMA'd once for the whole kernel.
    if resident_bytes(tm) <= budget:
        return tm, d_ffn, 1, resident_bytes(tm)

    # Weights must stream: per-weight-byte arithmetic intensity == tm, so on
    # big-VMEM parts (v5e/v6e, 128 MiB) grow the row tile to stay MXU-bound.
    if vmem_cap >= (100 << 20):
        tm = max(min(max(tm_req, 1024), Mp), 8)

    divisors = [t for t in range(128, d_ffn + 1, 128) if d_ffn % t == 0]
    while True:
        best = None
        for t in divisors:
            if streaming_bytes(tm, t) <= budget:
                best = t
        if best is not None:
            return tm, best, d_ffn // best, streaming_bytes(tm, best)
        if tm > 128:
            tm = max(128, tm // 2)
            continue
        # Last resort: smallest legal slice even if over the (conservative)
        # budget estimate.
        t = divisors[0] if divisors else d_ffn
        return tm, t, max(1, d_ffn // t), streaming_bytes(tm, t)


# ---------------------------------------------------------------------------
# pallas_call builder
# ---------------------------------------------------------------------------

def _build_call(M, Mp, d_model, d_ffn, tm, tf, num_m, num_k,
                x_dtype, w_dtype, vmem_est):
    use_pm = _supports_pipeline_mode()

    def spec(shape, index_map, single_buffer):
        if single_buffer and use_pm:
            return pl.BlockSpec(shape, index_map, pipeline_mode=pl.Buffered(1))
        return pl.BlockSpec(shape, index_map)

    vmem_cap = _vmem_capacity_bytes()
    vmem_limit = int(min(max(vmem_est * 3 // 2 + (4 << 20), 16 << 20),
                         int(vmem_cap * 0.92)))

    xb = jnp.dtype(x_dtype).itemsize
    wb = jnp.dtype(w_dtype).itemsize
    weight_bytes = 2 * d_model * d_ffn * wb
    if num_k > 1:
        weight_bytes *= num_m            # weight slices re-streamed per row tile
    cost = pl.CostEstimate(
        flops=4 * M * d_model * d_ffn,
        transcendentals=0,
        bytes_accessed=int(2 * M * d_model * xb + weight_bytes),
    )

    if num_k == 1:
        grid_spec = pltpu.PrefetchScalarGridSpec(
            num_scalar_prefetch=0,
            grid=(num_m,),
            in_specs=[
                pl.BlockSpec((tm, d_model), lambda i: (i, 0)),       # x rows
                spec((d_model, d_ffn), lambda i: (0, 0), True),      # W1 (resident)
                spec((1, d_ffn), lambda i: (0, 0), True),            # b1
                spec((d_ffn, d_model), lambda i: (0, 0), True),      # W2 (resident)
                spec((1, d_model), lambda i: (0, 0), True),          # b2
            ],
            out_specs=pl.BlockSpec((tm, d_model), lambda i: (i, 0)),
        )
        kernel = ffn_kernel_resident
        dims = ("parallel",)
    else:
        grid_spec = pltpu.PrefetchScalarGridSpec(
            num_scalar_prefetch=0,
            grid=(num_m, num_k),
            in_specs=[
                pl.BlockSpec((tm, d_model), lambda i, k: (i, 0)),    # x rows
                pl.BlockSpec((d_model, tf), lambda i, k: (0, k)),    # W1 slice
                pl.BlockSpec((1, tf), lambda i, k: (0, k)),          # b1 slice
                pl.BlockSpec((tf, d_model), lambda i, k: (k, 0)),    # W2 slice
                spec((1, d_model), lambda i, k: (0, 0), True),       # b2
            ],
            out_specs=pl.BlockSpec((tm, d_model), lambda i, k: (i, 0)),
            scratch_shapes=[pltpu.VMEM((tm, d_model), jnp.float32)],
        )
        kernel = ffn_kernel_streaming
        dims = ("parallel", "arbitrary")

    return pl.pallas_call(
        kernel,
        out_shape=jax.ShapeDtypeStruct((Mp, d_model), x_dtype),
        grid_spec=grid_spec,
        compiler_params=pltpu.CompilerParams(
            dimension_semantics=dims,
            vmem_limit_bytes=vmem_limit,
        ),
        cost_estimate=cost,
    )


# ---------------------------------------------------------------------------
# Public wrapper
# ---------------------------------------------------------------------------

def positionwise_feed_forward(x, w1, b1, w2, b2, *, tm=512):
    """x: (B, S, d_model). w1: (d_model, d_ffn). w2: (d_ffn, d_model)."""
    B, S, d_model = x.shape
    d_ffn = w1.shape[1]
    M = B * S
    Mp = _round_up(M, 8)                  # pad only to the 8-sublane granule

    tm_eff, tf, num_k, vmem_est = _choose_tiles(Mp, d_model, d_ffn,
                                                x.dtype, w1.dtype, tm)
    num_m = (Mp + tm_eff - 1) // tm_eff   # ragged last row block handled by Pallas
    # Guarantee >= 2 row blocks so the "parallel" axis can feed both
    # TensorCores on a v7x megacore.
    if num_m < 2 and Mp > 8:
        tm_eff = _round_up((Mp + 1) // 2, 8)
        num_m = (Mp + tm_eff - 1) // tm_eff

    x2 = x.reshape(M, d_model)
    if Mp != M:
        x2 = jnp.pad(x2, ((0, Mp - M), (0, 0)))
    b1_2 = b1.reshape(1, d_ffn)
    b2_2 = b2.reshape(1, d_model)

    call = _build_call(M, Mp, d_model, d_ffn, tm_eff, tf, num_m, num_k,
                       x.dtype, w1.dtype, vmem_est)
    out2 = call(x2, w1, b1_2, w2, b2_2)

    if Mp != M:
        out2 = out2[:M]
    return out2.reshape(B, S, d_model)


def init_params(key, d_model, d_ffn, dtype=jnp.float32):
    """Deterministic init mimicking nn.Linear (uniform +/- 1/sqrt(fan_in)).
    Weights stored as (in, out), i.e. transposed vs PyTorch's (out, in)."""
    k1, k2, k3, k4 = jax.random.split(key, 4)
    bound1 = 1.0 / (d_model ** 0.5)
    bound2 = 1.0 / (d_ffn ** 0.5)
    w1 = jax.random.uniform(k1, (d_model, d_ffn), dtype, -bound1, bound1)
    b1 = jax.random.uniform(k2, (d_ffn,), dtype, -bound1, bound1)
    w2 = jax.random.uniform(k3, (d_ffn, d_model), dtype, -bound2, bound2)
    b2 = jax.random.uniform(k4, (d_model,), dtype, -bound2, bound2)
    return w1, b1, w2, b2


if __name__ == "__main__":
    B, S, d_model, d_ffn = 2, 8, 32, 64

    key = jax.random.PRNGKey(0)
    kx, kp = jax.random.split(key)
    x = jax.random.normal(kx, (B, S, d_model), jnp.float32)
    w1, b1, w2, b2 = init_params(kp, d_model, d_ffn)

    out = positionwise_feed_forward(x, w1, b1, w2, b2)
    out = jax.block_until_ready(out)

    # pure-JAX reference (eval-mode dropout = identity)
    h_ref = jnp.maximum(x @ w1 + b1, 0.0)
    ref = h_ref @ w2 + b2

    assert out.shape == (B, S, d_model)
    assert jnp.allclose(out, ref, atol=1e-4, rtol=1e-4), \
        float(jnp.max(jnp.abs(out - ref)))
    print("KERNEL_OK")
</pallas_src>

<mosaic_0001>
module attributes {stable_mosaic.version = 11 : i64} {
  func.func @ffn_kernel_resident(%arg0: i32, %arg1: memref<8x32xf32, #tpu.memory_space<vmem>>, %arg2: memref<32x64xf32, #tpu.memory_space<vmem>>, %arg3: memref<1x64xf32, #tpu.memory_space<vmem>>, %arg4: memref<64x32xf32, #tpu.memory_space<vmem>>, %arg5: memref<1x32xf32, #tpu.memory_space<vmem>>, %arg6: memref<8x32xf32, #tpu.memory_space<vmem>>) attributes {dimension_semantics = [#tpu.dimension_semantics<parallel>], iteration_bounds = array<i64: 2>, scalar_prefetch = 0 : i64, scratch_operands = 0 : i64, tpu.core_type = #tpu.core_type<tc>, window_params = [{transform_indices = @transform_0, window_bounds = array<i64: 8, 32>}, {pipeline_mode = #tpu.pipeline_mode<synchronous>, transform_indices = @transform_1, window_bounds = array<i64: 32, 64>}, {pipeline_mode = #tpu.pipeline_mode<synchronous>, transform_indices = @transform_2, window_bounds = array<i64: 1, 64>}, {pipeline_mode = #tpu.pipeline_mode<synchronous>, transform_indices = @transform_3, window_bounds = array<i64: 64, 32>}, {pipeline_mode = #tpu.pipeline_mode<synchronous>, transform_indices = @transform_4, window_bounds = array<i64: 1, 32>}, {transform_indices = @transform_5, window_bounds = array<i64: 8, 32>}]} {
    %c0 = arith.constant 0 : index
    %c0_0 = arith.constant 0 : index
    %0 = vector.load %arg1[%c0, %c0_0] : memref<8x32xf32, #tpu.memory_space<vmem>>, vector<8x32xf32>
    %c0_1 = arith.constant 0 : index
    %c0_2 = arith.constant 0 : index
    %1 = vector.load %arg2[%c0_1, %c0_2] : memref<32x64xf32, #tpu.memory_space<vmem>>, vector<32x64xf32>
    %cst = arith.constant dense<0.000000e+00> : vector<8x64xf32>
    %2 = tpu.matmul %0, %1, %cst {dimension_numbers = #tpu.dot_dimension_numbers<[1], [0], [0], [1], [0, 0, 1, 1], [], []>} : vector<8x32xf32>, vector<32x64xf32>, vector<8x64xf32> -> vector<8x64xf32>
    %c0_3 = arith.constant 0 : index
    %c0_4 = arith.constant 0 : index
    %3 = vector.load %arg3[%c0_3, %c0_4] : memref<1x64xf32, #tpu.memory_space<vmem>>, vector<1x64xf32>
    %4 = vector.broadcast %3 : vector<1x64xf32> to vector<8x64xf32>
    %5 = arith.addf %2, %4 : vector<8x64xf32>
    %cst_5 = arith.constant 0.000000e+00 : f32
    %6 = vector.broadcast %cst_5 : f32 to vector<8x64xf32>
    %7 = arith.maximumf %5, %6 : vector<8x64xf32>
    %c0_6 = arith.constant 0 : index
    %c0_7 = arith.constant 0 : index
    %8 = vector.load %arg4[%c0_6, %c0_7] : memref<64x32xf32, #tpu.memory_space<vmem>>, vector<64x32xf32>
    %cst_8 = arith.constant dense<0.000000e+00> : vector<8x32xf32>
    %9 = tpu.matmul %7, %8, %cst_8 {dimension_numbers = #tpu.dot_dimension_numbers<[1], [0], [0], [1], [0, 0, 1, 1], [], []>} : vector<8x64xf32>, vector<64x32xf32>, vector<8x32xf32> -> vector<8x32xf32>
    %c0_9 = arith.constant 0 : index
    %c0_10 = arith.constant 0 : index
    %10 = vector.load %arg5[%c0_9, %c0_10] : memref<1x32xf32, #tpu.memory_space<vmem>>, vector<1x32xf32>
    %11 = vector.broadcast %10 : vector<1x32xf32> to vector<8x32xf32>
    %12 = arith.addf %9, %11 : vector<8x32xf32>
    %c0_11 = arith.constant 0 : index
    %c0_12 = arith.constant 0 : index
    %13 = vector.load %arg6[%c0_11, %c0_12] : memref<8x32xf32, #tpu.memory_space<vmem>>, vector<8x32xf32>
    tpu.vector_store %arg6[%c0_11, %c0_12], %12 {strides = array<i32>} : memref<8x32xf32, #tpu.memory_space<vmem>>, vector<8x32xf32>,
    return
  }
  func.func @transform_0(%arg0: i32) -> (i32, i32) {
    %c0_i32 = arith.constant 0 : i32
    %c0_i32_0 = arith.constant 0 : i32
    return %arg0, %c0_i32 : i32, i32
  }
  func.func @transform_1(%arg0: i32) -> (i32, i32) {
    %c0_i32 = arith.constant 0 : i32
    %c0_i32_0 = arith.constant 0 : i32
    %c0_i32_1 = arith.constant 0 : i32
    return %c0_i32, %c0_i32_0 : i32, i32
  }
  func.func @transform_2(%arg0: i32) -> (i32, i32) {
    %c0_i32 = arith.constant 0 : i32
    %c0_i32_0 = arith.constant 0 : i32
    %c0_i32_1 = arith.constant 0 : i32
    return %c0_i32, %c0_i32_0 : i32, i32
  }
  func.func @transform_3(%arg0: i32) -> (i32, i32) {
    %c0_i32 = arith.constant 0 : i32
    %c0_i32_0 = arith.constant 0 : i32
    %c0_i32_1 = arith.constant 0 : i32
    return %c0_i32, %c0_i32_0 : i32, i32
  }
  func.func @transform_4(%arg0: i32) -> (i32, i32) {
    %c0_i32 = arith.constant 0 : i32
    %c0_i32_0 = arith.constant 0 : i32
    %c0_i32_1 = arith.constant 0 : i32
    return %c0_i32, %c0_i32_0 : i32, i32
  }
  func.func @transform_5(%arg0: i32) -> (i32, i32) {
    %c0_i32 = arith.constant 0 : i32
    %c0_i32_0 = arith.constant 0 : i32
    return %arg0, %c0_i32 : i32, i32
  }
}

</mosaic_0001>

<bundles_post_ra>
// kernel: tpu_custom_call.1
= control target key start
LH: loop header
LB: loop body
LE: loop exit
PB: predicated region body
PF: predicated region fallthrough
CT: control target
= control target key end

     0   :  { %10 = vsyncpa [#allocation3], 0  ;;  %s830_s0 = inlined_call_operand.vmem [shape: f32[16,32], index: 0, kind: input, shape index: {}]   ;;  %s831_s1 = inlined_call_operand.vmem [shape: f32[32,64], index: 1, kind: input, shape index: {}]   ;;  %s832_s2 = inlined_call_operand.vmem [shape: f32[1,64], index: 2, kind: input, shape index: {}]   ;;  %s833_s3 = inlined_call_operand.vmem [shape: f32[64,32], index: 3, kind: input, shape index: {}]   ;;  %s834_s4 = inlined_call_operand.vmem [shape: f32[1,32], index: 4, kind: input, shape index: {}]   ;;  %s835_s5 = inlined_call_operand.hbm [shape: f32[16,32], index: 5, kind: output, shape index: {}]  }
   0x1   :  { %12 = vsyncpa [#allocation3 + $0x1], 0  ;;  %s686_s18 = smov 0   ;;  %s688_s19 = smov 0  }
   0x2   :  { %s690_s20 = smov 0   ;;  %s692_s21 = smov 0  }
   0x3 LB: > { %s707_s22 = sadd.s32 4294967295, %s650_s21   ;;  %s470_s23 = sadd.s32 4294967294, %s650_s21   ;;  %s650_s21 = sphi %s692_s21, %s841_s21   ;;  %s646_s20 = sphi %s690_s20, %s840_s20   ;;  %s642_s19 = sphi %s688_s19, %s839_s19   ;;  %s638_s18 = sphi %s686_s18, %s838_s18  }
   0x4   : > { %s711_s24 = sadd.s32 1, %s650_s21   ;;  %s135_s25 = sadd.s32 1, %s646_s20 }
   0x5   : > { %s132_s26 = ssub.s32 %s650_s21, %s711_s24  ;;  %p145_p0 = scmp.ne.s32.totalorder %s646_s20, %s642_s19 }
   0x6   : > { %p133_p1 = scmp.eq.s32.totalorder %s132_s26, 0  ;;  %p146_p2 = scmp.eq.s32.totalorder %s707_s22, 1 }
   0x7   : > { %p151_p3 = scmp.ne.s32.totalorder %s642_s19, %s638_s18  ;;  %p152_p4 = scmp.eq.s32.totalorder %s470_s23, 1 }
   0x8   : > { %s722_s27 = scalar_select %p133_p1, %s646_s20, %s135_s25  }
   0x9   : > { %p724_p5 = por %p146_p2, %p145_p0  ;;  %p728_p6 = por %p152_p4, %p151_p3 }
   0xa   : > { %p473_p7 = scmp.ge.s32.totalorder %s650_s21, 1  ;;  %p189_p8 = scmp.lt.s32.totalorder %s650_s21, 3 }
   0xc   : > { %p190_p9 = pnand %p473_p7, %p189_p8 }
   0xd   : > { %v221_v0 = vld [vmem:[%s831_s1] sm:$0xff] (!%p190_p9)  ;;  %v222_v1 = vld [vmem:[%s831_s1 + $0x8] sm:$0xff] (!%p190_p9)  ;;  %v223_v2 = vld [vmem:[%s831_s1 + $0x10] sm:$0xff] (!%p190_p9)  ;;  %v652_v3 = vmov (!%p190_p9), 0.0|0.0   ;;  %vm653_vm0 = vmmov (!%p190_p9), 0   ;;  %v654_v6 = vmov (!%p190_p9), 0.0  }
   0xe   : > { %193 = sbr.rel (%p190_p9) target bundleno = 470 (0x1d6), region = 40  ;;  %528 = vmatprep.subr.bf16.mxu0 (!%p190_p9), %v652_v3  ;;  %v529_v4 = vpack.c.bf16 (!%p190_p9), %v222_v1, %v221_v0  ;;  %v224_v5 = vld [vmem:[%s831_s1 + $0x18] sm:$0xff] (!%p190_p9)  ;;  %506 = vmatprep.mubr.msk.f32.mxu0 (!%p190_p9), %vm653_vm0, %v654_v6  ;;  %p216_p10 = scmp.lt.s32.totalorder (!%p190_p9), %s707_s22, 1  ;;  %v307_v7 = vld [vmem:[%s833_s3] sm:$0xff] (!%p190_p9)  ;;  %v308_v8 = vld [vmem:[%s833_s3 + $0x8] sm:$0xff] (!%p190_p9)  ;;  %vm232_vm1 = vcmask (!%p190_p9), 261120  }
   0xf   : > { %534 = vmatprep.subr.bf16.mxu1 (!%p190_p9), %v652_v3  ;;  %v535_v9 = vpack.c.bf16 (!%p190_p9), %v308_v8, %v307_v7  ;;  %v309_v10 = vld [vmem:[%s833_s3 + $0x10] sm:$0xff] (!%p190_p9)  ;;  %v310_v11 = vld [vmem:[%s833_s3 + $0x18] sm:$0xff] (!%p190_p9)  ;;  %525 = vmatprep.mubr.msk.f32.mxu1 (!%p190_p9), %vm653_vm0, %v654_v6  ;;  %v532_v12 = vpack.c.bf16 (!%p190_p9), %v224_v5, %v223_v2  ;;  %v311_v14 = vld [vmem:[%s833_s3 + $0x20] sm:$0xff] (!%p190_p9)  ;;  %vm322_vm2 = vcmask (!%p190_p9), 523264   ;;  %s213_s26 = sand.u32 (!%p190_p9), 1, %s642_s19   ;;  %s481_s8 = sshll.u32 (!%p190_p9), %s707_s22, 7 }
  0x10   : > { %530 = vmatpush3.bf16.msra.mxu0 (!%p190_p9), %v529_v4  ;;  %v538_v13 = vpack.c.bf16 (!%p190_p9), %v310_v11, %v309_v10  ;;  %v312_v15 = vld [vmem:[%s833_s3 + $0x28] sm:$0xff] (!%p190_p9)  ;;  %v313_v18 = vld [vmem:[%s833_s3 + $0x30] sm:$0xff] (!%p190_p9)  ;;  %v314_v19 = vld [vmem:[%s833_s3 + $0x38] sm:$0xff] (!%p190_p9)  ;;  %s398_s14 = scalar_lea.sflag (!%p190_p9), [#allocation3], %s213_s26 }
  0x11   : > { %531 = vmatprep.subr.bf16.mxu0 (!%p190_p9), %v652_v3  ;;  %536 = vmatpush3.bf16.msra.mxu1 (!%p190_p9), %v535_v9  ;;  %v541_v17 = vpack.c.bf16 (!%p190_p9), %v312_v15, %v311_v14  ;;  %v544_v20 = vpack.c.bf16 (!%p190_p9), %v314_v19, %v313_v18  ;;  %v476_v21 = vld [vmem:[%s832_s2] ss:$0 sm:$0xff] (!%p190_p9) }
  0x12   : > { %537 = vmatprep.subr.bf16.mxu1 (!%p190_p9), %v652_v3  ;;  %v478_v26 = vld [vmem:[%s834_s4] ss:$0 sm:$0xff] (!%p190_p9) }
  0x14   : > { %533 = vmatpush3.bf16.msra.mxu0 (!%p190_p9), %v532_v12 }
  0x15   : > { %s217_s30 = scalar_select %p216_p10, %s707_s22, 1  ;;  %539 = vmatpush3.bf16.msra.mxu1 %v538_v13 }
  0x16   : > { %540 = vmatprep.subr.bf16.mxu1 %v652_v3  ;;  %s655_s22 = smov [#allocation2]  }
  0x17   : > { %s475_s6 = sshll.u32 %s217_s30, 3  ;;  %s474_s30 = sshll.u32 %s213_s26, 3 }
  0x18   : > { %s219_s13 = scalar_lea.vmem %s830_s0, %s475_s6  ;;  %s215_s9 = scalar_lea.vmem [#allocation2], %s474_s30 }
  0x19   : > { %v220_v16 = vld [vmem:[%s219_s13] sm:$0xff]  ;;  %542 = vmatpush3.bf16.msra.mxu1 %v541_v17  ;;  %s411_s10 = sshll.u32 %s215_s9, 4  ;;  %s787_s13 = scalar_lea.hbm %s835_s5, %s481_s8  ;;  %s789_s10 = int_to_ptr.vmem [resolvable:$true] %s411_s10 }
  0x1a   : > { %507 = vmatmul.mubr.msk.f32.vlgmr.msra.gmra.mrb[0].mxu0 %vm232_vm1, %v220_v16  ;;  %543 = vmatprep.subr.bf16.mxu1 %v652_v3  ;;  %s588_s15 = scalar_lea.vmem %s789_s10, 128  ;;  %s592_s16 = sshll.u32 %s655_s22, 4  ;;  %s593_s16 = int_to_ptr.vmem [resolvable:$false] %s592_s16 }
  0x1b   : > { %p589_p11 = scmp.ne.s32.totalorder %s789_s10, %s588_s15  ;;  %s594_s17 = scalar_lea.vmem %s593_s16, 256 }
  0x1c   : > { %p595_p0 = scmp.lt.s32.totalorder %s789_s10, %s593_s16  ;;  %p596_p1 = scmp.lt.s32.totalorder %s594_s17, %s588_s15 }
  0x1d   : > { %545 = vmatpush3.bf16.msra.mxu1 %v544_v20  ;;  %p590_p12 = pnand %p589_p11, %p724_p5 }
  0x1e   : > { %p597_p2 = por %p596_p1, %p595_p0 }
  0x1f   : > { %p591_p13 = pneg %p590_p12 }
  0x21   : > { %p598_p3 = pnand %p597_p2, %p591_p13 }
  0xed   : > { %v302_v22 = vpop.f32.mrb[0].mxu0 }
  0xee   : > { %v303_v23 = vadd.f32 %v476_v21, %v302_v22  ;;  %v508_v24 = vpop.f32.mrb[1].mxu0 }
  0xf0   : > { %v306_v25 = vmax.f32 %v303_v23, 0.0 }
  0xf2   : > { %526 = vmatmul.mubr.msk.f32.vlgmr.msra.gmra.mrb[0].mxu1 %vm322_vm2, %v306_v25 }
 0x1c5   : > { %v392_v27 = vpop.f32.mrb[0].mxu1 }
 0x1c6   : > { %v393_v28 = vadd.f32 %v478_v26, %v392_v27  ;;  %v527_v29 = vpop.f32.mrb[1].mxu1 }
 0x1c8   : > { %396 = vst.msk [vmem:[%s215_s9] sm:$0xff] %vm232_vm1, %v393_v28 }
 0x1c9   : > { %601 = shalt.err (!%p598_p3)
}
 0x1ca   : > { %s602_s23 = scalar_lea.hbm %s787_s13, 128  ;;  %s606_s30 = scalar_lea.hbm %s835_s5, 256 }
 0x1cb   : > { %p603_p4 = scmp.ne.s32.totalorder %s787_s13, %s602_s23  ;;  %p607_p9 = scmp.lt.u32.totalorder %s787_s13, %s835_s5 }
 0x1cc   : > { %p608_p10 = scmp.lt.u32.totalorder %s606_s30, %s602_s23  ;;  %p610_p12 = scmp.lt.u32.totalorder %s602_s23, %s787_s13 }
 0x1cd   : > { %p604_p7 = pnand %p603_p4, %p724_p5 }
 0x1ce   : > { %p609_p11 = por %p608_p10, %p607_p9 }
 0x1cf   : > { %p605_p8 = pneg %p604_p7 }
 0x1d0   : > { %p611_p13 = por %p610_p12, %p609_p11 }
 0x1d2   : > { %p612_p0 = pnand %p611_p13, %p605_p8 }
 0x1d4   : > { %615 = shalt.err (!%p612_p0)
}
 0x1d5   : > { %546 = dma.vmem_to_hbm [thread:$0]  (%p724_p5), %s789_s10, 128, %s787_s13, %s398_s14  }
 0x1d6 PF: > { %p552_p1 = scmp.ge.s32.totalorder %s650_s21, 2  ;;  %s423_s8 = sand.u32 1, %s638_s18  }
 0x1d7   : > { %s424_s9 = scalar_lea.sflag [#allocation3], %s423_s8 }
 0x1d8   : > { %p549_p2 = pnand %p552_p1, %p728_p6 }
 0x1da   : > { %633 = dma.done.wait (!%p549_p2), %s424_s9, 128  }
 0x1db   : > { %635 = vsyncadd (!%p549_p2), %s424_s9, 4294967168  ;;  %p15_p3 = scmp.ge.s32.totalorder %s711_s24, 4   ;;  %s838_s18 = smov %s642_s19 }
 0x1dc   : > { %s839_s19 = smov %s646_s20  ;;  %s840_s20 = smov %s722_s27 }
 0x1dd   : > { %s841_s21 = smov %s711_s24  ;;  %17 = sbr.rel (!%p15_p3) target bundleno = 3 (0x3), region = 75 }
 0x1e4   :  { %429 = vsyncpa [#allocation3], 1 }
 0x1e5   :  { %431 = vsyncpa [#allocation3 + $0x1], 1 }

</bundles_post_ra>
